<compile_context>
chip_gen: v6e
topology: v6e:2x2x1
jax: 0.10.0
libtpu: 0.0.40
codegen_flags: <defaults>
</compile_context>

<pallas_src>
import functools

import jax
import jax.numpy as jnp
from jax import lax
from jax.experimental import pallas as pl
from jax.experimental.pallas import tpu as pltpu

HEAD_ROWS = 8   # sublane-aligned head-output rows; row 0 = p, row 1 = c
LANE = 128      # TPU lane width


def _round_up(x, m):
    return ((x + m - 1) // m) * m


def _mlp_kernel(x_ref, w1_ref, b1_ref, w2_ref, b2_ref, wht_ref, bht_ref, out_ref):
    cdt = w1_ref.dtype                      # compute dtype baked into the weights
    x = x_ref[...].astype(cdt)

    # fc1 + relu (MXU matmul, f32 accumulation; bias/relu in f32)
    h1 = jnp.dot(x, w1_ref[...], preferred_element_type=jnp.float32) + b1_ref[...]
    h1 = jnp.maximum(h1, 0.0)

    # fc2 + relu
    h2 = jnp.dot(h1.astype(cdt), w2_ref[...],
                 preferred_element_type=jnp.float32) + b2_ref[...]
    h2 = jnp.maximum(h2, 0.0)

    # Fused heads, transposed: (HEAD_ROWS, h2) x (TB, h2) contracted on h2
    # -> (HEAD_ROWS, TB).  Batch lives on the lane axis -> lane-dense store.
    z = lax.dot_general(wht_ref[...], h2.astype(cdt),
                        dimension_numbers=(((1,), (1,)), ((), ())),
                        preferred_element_type=jnp.float32)
    z = z + bht_ref[...]                    # (HEAD_ROWS, 1) broadcasts over lanes
    out_ref[...] = jax.nn.sigmoid(z)


def prepare_params(raw, compute_dtype=jnp.float32):
    """One-time packing of the two 1-wide heads into a transposed (8, h2) head.

    Row 0 = direction head, row 1 = confidence head, rows 2..7 = zeros.
    Weights are pre-cast to `compute_dtype` (use jnp.bfloat16 for the native
    MXU fast path on v5e/v6e/v7x); biases stay f32.
    """
    h2 = raw["w2"].shape[1]
    wh_t = jnp.zeros((HEAD_ROWS, h2), jnp.float32)
    wh_t = wh_t.at[0].set(raw["wd"][:, 0]).at[1].set(raw["wc"][:, 0])
    bh_t = jnp.zeros((HEAD_ROWS, 1), jnp.float32)
    bh_t = bh_t.at[0, 0].set(raw["bd"][0, 0]).at[1, 0].set(raw["bc"][0, 0])
    cd = compute_dtype
    return {"w1": raw["w1"].astype(cd), "b1": raw["b1"],
            "w2": raw["w2"].astype(cd), "b2": raw["b2"],
            "wh_t": wh_t.astype(cd), "bh_t": bh_t}


def _pick_tiles(B, block_b):
    """Balanced batch tiling. Returns (TB, Bp)."""
    if B > block_b or B >= 4 * LANE:
        # Multi-tile: lane-dense transposed output needs TB % 128 == 0.
        # At least cdiv(B, block_b) tiles (soft VMEM cap) and at least 4 tiles
        # once B is big enough, so v7x's two TensorCores each get >=2 steps.
        n_tiles = max(pl.cdiv(B, block_b), min(4, pl.cdiv(B, LANE)))
        TB = _round_up(pl.cdiv(B, n_tiles), LANE)
        Bp = _round_up(B, TB)
    else:
        # Single tile: block dims equal the (padded) array dims, so only the
        # 8-sublane alignment is required -> at most 7 dead rows.
        TB = _round_up(max(B, 8), 8)
        Bp = TB
    return TB, Bp


@functools.partial(jax.jit, static_argnames=("block_b",))
def prediction_network_forward(x, params, *, block_b=1024):
    """x: (B, input_dim) f32. params: output of prepare_params(). Returns (p, c)."""
    B, in_dim = x.shape
    w1, b1 = params["w1"], params["b1"]
    w2, b2 = params["w2"], params["b2"]
    wh_t, bh_t = params["wh_t"], params["bh_t"]
    hidden = w1.shape[1]
    h2dim = w2.shape[1]

    TB, Bp = _pick_tiles(B, block_b)
    if Bp != B:
        x = jnp.pad(x, ((0, Bp - B), (0, 0)))

    grid = (Bp // TB,)

    # x / out tiles follow the grid step; all weights & biases use constant
    # index maps so they stay resident in VMEM across grid steps.
    # (For much larger hidden/in_dim, tile the K dimension and/or raise
    #  vmem_limit_bytes; at these sizes everything fits comfortably even in
    #  v7x's 32 MiB scoped default.)
    in_specs = [
        pl.BlockSpec((TB, in_dim), lambda i: (i, 0)),           # x tile (pipelined)
        pl.BlockSpec((in_dim, hidden), lambda i: (0, 0)),       # w1 (resident)
        pl.BlockSpec((1, hidden), lambda i: (0, 0)),            # b1
        pl.BlockSpec((hidden, h2dim), lambda i: (0, 0)),        # w2
        pl.BlockSpec((1, h2dim), lambda i: (0, 0)),             # b2
        pl.BlockSpec((HEAD_ROWS, h2dim), lambda i: (0, 0)),     # fused heads W^T
        pl.BlockSpec((HEAD_ROWS, 1), lambda i: (0, 0)),         # fused heads b
    ]
    out_specs = pl.BlockSpec((HEAD_ROWS, TB), lambda i: (0, i))

    out = pl.pallas_call(
        _mlp_kernel,
        out_shape=jax.ShapeDtypeStruct((HEAD_ROWS, Bp), jnp.float32),
        grid=grid,
        in_specs=in_specs,
        out_specs=out_specs,
        compiler_params=pltpu.CompilerParams(
            dimension_semantics=("parallel",)),
    )(x, w1, b1, w2, b2, wh_t, bh_t)

    p = out[0:1, :B].T        # (B, 1) — contiguous row slice, cheap transpose
    c = out[1:2, :B].T        # (B, 1)
    return p, c


def init_params(key, input_dim, hidden_dim=128):
    """Deterministic init mimicking nn.Linear default U(-1/sqrt(in), 1/sqrt(in))."""
    h2 = hidden_dim // 2
    ks = jax.random.split(key, 8)

    def lin(kw, kb, fan_in, fan_out):
        bound = 1.0 / jnp.sqrt(fan_in)
        w = jax.random.uniform(kw, (fan_in, fan_out), jnp.float32, -bound, bound)
        b = jax.random.uniform(kb, (1, fan_out), jnp.float32, -bound, bound)
        return w, b

    w1, b1 = lin(ks[0], ks[1], input_dim, hidden_dim)
    w2, b2 = lin(ks[2], ks[3], hidden_dim, h2)
    wd, bd = lin(ks[4], ks[5], h2, 1)
    wc, bc = lin(ks[6], ks[7], h2, 1)
    return {"w1": w1, "b1": b1, "w2": w2, "b2": b2,
            "wd": wd, "bd": bd, "wc": wc, "bc": bc}


def _reference_forward(x, p):
    h1 = jnp.maximum(x @ p["w1"] + p["b1"], 0.0)
    h2 = jnp.maximum(h1 @ p["w2"] + p["b2"], 0.0)
    return (jax.nn.sigmoid(h2 @ p["wd"] + p["bd"]),
            jax.nn.sigmoid(h2 @ p["wc"] + p["bc"]))


if __name__ == "__main__":
    key = jax.random.PRNGKey(0)

    # --- small toy shape (single tile, f32 path) ---
    k_x, k_p = jax.random.split(key)
    B, input_dim, hidden_dim = 8, 16, 32
    x = jax.random.normal(k_x, (B, input_dim), dtype=jnp.float32)
    raw = init_params(k_p, input_dim, hidden_dim)
    params = prepare_params(raw)

    p_out, c_out = prediction_network_forward(x, params)
    p_out = jax.block_until_ready(p_out)
    c_out = jax.block_until_ready(c_out)

    p_ref, c_ref = _reference_forward(x, raw)
    assert p_out.shape == (B, 1) and c_out.shape == (B, 1)
    assert jnp.allclose(p_out, p_ref, atol=1e-5, rtol=1e-5)
    assert jnp.allclose(c_out, c_ref, atol=1e-5, rtol=1e-5)

    # --- B=300: now a single balanced 304-row tile (no 2x256 pad waste) ---
    k_x2, k_p2 = jax.random.split(jax.random.PRNGKey(1))
    B2, in2 = 300, 24
    x2 = jax.random.normal(k_x2, (B2, in2), dtype=jnp.float32)
    raw2 = init_params(k_p2, in2, 128)
    params2 = prepare_params(raw2)

    p2, c2 = prediction_network_forward(x2, params2)
    p2 = jax.block_until_ready(p2)
    c2 = jax.block_until_ready(c2)

    p2_ref, c2_ref = _reference_forward(x2, raw2)
    assert p2.shape == (B2, 1) and c2.shape == (B2, 1)
    assert jnp.allclose(p2, p2_ref, atol=1e-5, rtol=1e-5)
    assert jnp.allclose(c2, c2_ref, atol=1e-5, rtol=1e-5)

    # --- B=600: exercises the multi-tile (lane-dense transposed output) path ---
    k_x3, k_p3 = jax.random.split(jax.random.PRNGKey(2))
    B3, in3 = 600, 24
    x3 = jax.random.normal(k_x3, (B3, in3), dtype=jnp.float32)
    raw3 = init_params(k_p3, in3, 128)
    params3 = prepare_params(raw3)

    p3, c3 = prediction_network_forward(x3, params3)
    p3 = jax.block_until_ready(p3)
    c3 = jax.block_until_ready(c3)

    p3_ref, c3_ref = _reference_forward(x3, raw3)
    assert p3.shape == (B3, 1) and c3.shape == (B3, 1)
    assert jnp.allclose(p3, p3_ref, atol=1e-5, rtol=1e-5)
    assert jnp.allclose(c3, c3_ref, atol=1e-5, rtol=1e-5)

    # --- bf16 MXU fast path (f32 accumulation), looser tolerance ---
    params3_bf16 = prepare_params(raw3, compute_dtype=jnp.bfloat16)
    p3b, c3b = prediction_network_forward(x3, params3_bf16)
    p3b = jax.block_until_ready(p3b)
    c3b = jax.block_until_ready(c3b)
    assert jnp.allclose(p3b, p3_ref, atol=5e-2, rtol=5e-2)
    assert jnp.allclose(c3b, c3_ref, atol=5e-2, rtol=5e-2)

    print("KERNEL_OK")
</pallas_src>

<mosaic_0001>
module attributes {stable_mosaic.version = 11 : i64} {
  func.func @_mlp_kernel(%arg0: i32, %arg1: memref<8x16xf32, #tpu.memory_space<vmem>>, %arg2: memref<16x32xf32, #tpu.memory_space<vmem>>, %arg3: memref<1x32xf32, #tpu.memory_space<vmem>>, %arg4: memref<32x16xf32, #tpu.memory_space<vmem>>, %arg5: memref<1x16xf32, #tpu.memory_space<vmem>>, %arg6: memref<8x16xf32, #tpu.memory_space<vmem>>, %arg7: memref<8x1xf32, #tpu.memory_space<vmem>>, %arg8: memref<8x8xf32, #tpu.memory_space<vmem>>) attributes {dimension_semantics = [#tpu.dimension_semantics<parallel>], iteration_bounds = array<i64: 1>, scalar_prefetch = 0 : i64, scratch_operands = 0 : i64, tpu.core_type = #tpu.core_type<tc>, window_params = [{transform_indices = @transform_0, window_bounds = array<i64: 8, 16>}, {pipeline_mode = #tpu.pipeline_mode<synchronous>, transform_indices = @transform_1, window_bounds = array<i64: 16, 32>}, {pipeline_mode = #tpu.pipeline_mode<synchronous>, transform_indices = @transform_2, window_bounds = array<i64: 1, 32>}, {pipeline_mode = #tpu.pipeline_mode<synchronous>, transform_indices = @transform_3, window_bounds = array<i64: 32, 16>}, {pipeline_mode = #tpu.pipeline_mode<synchronous>, transform_indices = @transform_4, window_bounds = array<i64: 1, 16>}, {pipeline_mode = #tpu.pipeline_mode<synchronous>, transform_indices = @transform_5, window_bounds = array<i64: 8, 16>}, {pipeline_mode = #tpu.pipeline_mode<synchronous>, transform_indices = @transform_6, window_bounds = array<i64: 8, 1>}, {transform_indices = @transform_7, window_bounds = array<i64: 8, 8>}]} {
    %c0 = arith.constant 0 : index
    %c0_0 = arith.constant 0 : index
    %0 = vector.load %arg1[%c0, %c0_0] : memref<8x16xf32, #tpu.memory_space<vmem>>, vector<8x16xf32>
    %c0_1 = arith.constant 0 : index
    %c0_2 = arith.constant 0 : index
    %1 = vector.load %arg2[%c0_1, %c0_2] : memref<16x32xf32, #tpu.memory_space<vmem>>, vector<16x32xf32>
    %cst = arith.constant dense<0.000000e+00> : vector<8x32xf32>
    %2 = tpu.matmul %0, %1, %cst {dimension_numbers = #tpu.dot_dimension_numbers<[1], [0], [0], [1], [0, 0, 1, 1], [], []>} : vector<8x16xf32>, vector<16x32xf32>, vector<8x32xf32> -> vector<8x32xf32>
    %c0_3 = arith.constant 0 : index
    %c0_4 = arith.constant 0 : index
    %3 = vector.load %arg3[%c0_3, %c0_4] : memref<1x32xf32, #tpu.memory_space<vmem>>, vector<1x32xf32>
    %4 = vector.broadcast %3 : vector<1x32xf32> to vector<8x32xf32>
    %5 = arith.addf %2, %4 : vector<8x32xf32>
    %cst_5 = arith.constant 0.000000e+00 : f32
    %6 = vector.broadcast %cst_5 : f32 to vector<8x32xf32>
    %7 = arith.maximumf %5, %6 : vector<8x32xf32>
    %c0_6 = arith.constant 0 : index
    %c0_7 = arith.constant 0 : index
    %8 = vector.load %arg4[%c0_6, %c0_7] : memref<32x16xf32, #tpu.memory_space<vmem>>, vector<32x16xf32>
    %cst_8 = arith.constant dense<0.000000e+00> : vector<8x16xf32>
    %9 = tpu.matmul %7, %8, %cst_8 {dimension_numbers = #tpu.dot_dimension_numbers<[1], [0], [0], [1], [0, 0, 1, 1], [], []>} : vector<8x32xf32>, vector<32x16xf32>, vector<8x16xf32> -> vector<8x16xf32>
    %c0_9 = arith.constant 0 : index
    %c0_10 = arith.constant 0 : index
    %10 = vector.load %arg5[%c0_9, %c0_10] : memref<1x16xf32, #tpu.memory_space<vmem>>, vector<1x16xf32>
    %11 = vector.broadcast %10 : vector<1x16xf32> to vector<8x16xf32>
    %12 = arith.addf %9, %11 : vector<8x16xf32>
    %cst_11 = arith.constant 0.000000e+00 : f32
    %13 = vector.broadcast %cst_11 : f32 to vector<8x16xf32>
    %14 = arith.maximumf %12, %13 : vector<8x16xf32>
    %c0_12 = arith.constant 0 : index
    %c0_13 = arith.constant 0 : index
    %15 = vector.load %arg6[%c0_12, %c0_13] : memref<8x16xf32, #tpu.memory_space<vmem>>, vector<8x16xf32>
    %cst_14 = arith.constant dense<0.000000e+00> : vector<8x8xf32>
    %16 = tpu.matmul %15, %14, %cst_14 {dimension_numbers = #tpu.dot_dimension_numbers<[1], [1], [0], [0], [0, 0, 1, 0], [], []>} : vector<8x16xf32>, vector<8x16xf32>, vector<8x8xf32> -> vector<8x8xf32>
    %c0_15 = arith.constant 0 : index
    %c0_16 = arith.constant 0 : index
    %17 = vector.load %arg7[%c0_15, %c0_16] : memref<8x1xf32, #tpu.memory_space<vmem>>, vector<8x1xf32>
    %18 = vector.broadcast %17 : vector<8x1xf32> to vector<8x8xf32>
    %19 = arith.addf %16, %18 : vector<8x8xf32>
    %20 = arith.negf %19 : vector<8x8xf32>
    %21 = math.exp %20 : vector<8x8xf32>
    %cst_17 = arith.constant 1.000000e+00 : f32
    %22 = vector.broadcast %cst_17 : f32 to vector<8x8xf32>
    %23 = arith.addf %22, %21 : vector<8x8xf32>
    %24 = arith.divf %22, %23 : vector<8x8xf32>
    %c0_18 = arith.constant 0 : index
    %c0_19 = arith.constant 0 : index
    %25 = vector.load %arg8[%c0_18, %c0_19] : memref<8x8xf32, #tpu.memory_space<vmem>>, vector<8x8xf32>
    tpu.vector_store %arg8[%c0_18, %c0_19], %24 {strides = array<i32>} : memref<8x8xf32, #tpu.memory_space<vmem>>, vector<8x8xf32>,
    return
  }
  func.func @transform_0(%arg0: i32) -> (i32, i32) {
    %c0_i32 = arith.constant 0 : i32
    %c0_i32_0 = arith.constant 0 : i32
    return %arg0, %c0_i32 : i32, i32
  }
  func.func @transform_1(%arg0: i32) -> (i32, i32) {
    %c0_i32 = arith.constant 0 : i32
    %c0_i32_0 = arith.constant 0 : i32
    %c0_i32_1 = arith.constant 0 : i32
    return %c0_i32, %c0_i32_0 : i32, i32
  }
  func.func @transform_2(%arg0: i32) -> (i32, i32) {
    %c0_i32 = arith.constant 0 : i32
    %c0_i32_0 = arith.constant 0 : i32
    %c0_i32_1 = arith.constant 0 : i32
    return %c0_i32, %c0_i32_0 : i32, i32
  }
  func.func @transform_3(%arg0: i32) -> (i32, i32) {
    %c0_i32 = arith.constant 0 : i32
    %c0_i32_0 = arith.constant 0 : i32
    %c0_i32_1 = arith.constant 0 : i32
    return %c0_i32, %c0_i32_0 : i32, i32
  }
  func.func @transform_4(%arg0: i32) -> (i32, i32) {
    %c0_i32 = arith.constant 0 : i32
    %c0_i32_0 = arith.constant 0 : i32
    %c0_i32_1 = arith.constant 0 : i32
    return %c0_i32, %c0_i32_0 : i32, i32
  }
  func.func @transform_5(%arg0: i32) -> (i32, i32) {
    %c0_i32 = arith.constant 0 : i32
    %c0_i32_0 = arith.constant 0 : i32
    %c0_i32_1 = arith.constant 0 : i32
    return %c0_i32, %c0_i32_0 : i32, i32
  }
  func.func @transform_6(%arg0: i32) -> (i32, i32) {
    %c0_i32 = arith.constant 0 : i32
    %c0_i32_0 = arith.constant 0 : i32
    %c0_i32_1 = arith.constant 0 : i32
    return %c0_i32, %c0_i32_0 : i32, i32
  }
  func.func @transform_7(%arg0: i32) -> (i32, i32) {
    %c0_i32 = arith.constant 0 : i32
    %c0_i32_0 = arith.constant 0 : i32
    return %c0_i32, %arg0 : i32, i32
  }
}

</mosaic_0001>

<bundles_post_ra>
// kernel: prediction_network_forward.1
= control target key start
LH: loop header
LB: loop body
LE: loop exit
PB: predicated region body
PF: predicated region fallthrough
CT: control target
= control target key end

     0   :  { %v340_v0 = vmov 0.0   ;;  %vm341_vm0 = vmmov 0   ;;  %vm36_vm1 = vcmask 130048   ;;  %vm122_vm2 = vcmask 261120   ;;  %s422_s1 = inlined_call_operand.vmem [shape: f32[16,32], index: 1, kind: input, shape index: {}]   ;;  %s423_s0 = inlined_call_operand.vmem [shape: f32[8,16], index: 0, kind: input, shape index: {}]   ;;  %s424_s3 = inlined_call_operand.vmem [shape: f32[32,16], index: 3, kind: input, shape index: {}]   ;;  %s425_s2 = inlined_call_operand.vmem [shape: f32[1,32], index: 2, kind: input, shape index: {}]   ;;  %s426_s6 = inlined_call_operand.vmem [shape: f32[8,1], index: 6, kind: input, shape index: {}]   ;;  %s427_s4 = inlined_call_operand.vmem [shape: f32[1,16], index: 4, kind: input, shape index: {}]   ;;  %s428_s5 = inlined_call_operand.vmem [shape: f32[8,16], index: 5, kind: input, shape index: {}]   ;;  %s429_s7 = inlined_call_operand.vmem [shape: f32[8,8], index: 7, kind: output, shape index: {}]  }
   0x1   :  { %309 = vmatprep.subr.mxu0 %v340_v0  ;;  %v28_v1 = vld [vmem:[%s422_s1 + $0x8] sm:$0xff]  ;;  %v27_v2 = vld [vmem:[%s422_s1] sm:$0xff]  ;;  %313 = vmatprep.mubr.msk.f32.mxu0 %vm341_vm0, %v340_v0  ;;  %v114_v4 = vld [vmem:[%s424_s3 + $0x18] sm:$0xff]  ;;  %v342_v13 = vmov 0   ;;  %vm286_vm3 = vcmask 64512  }
   0x2   :  { %310 = vmatpush3.msra.mxu0 %v28_v1  ;;  %v26_v3 = vld [vmem:[%s423_s0] sm:$0xff]  ;;  %316 = vmatprep.subr.mxu1 %v340_v0  ;;  %v113_v5 = vld [vmem:[%s424_s3 + $0x10] sm:$0xff]  ;;  %v112_v6 = vld [vmem:[%s424_s3 + $0x8] sm:$0xff] }
   0x3   :  { %311 = vmatprep.subr.mxu0 %v340_v0  ;;  %317 = vmatpush3.msra.mxu1 %v114_v4  ;;  %v111_v7 = vld [vmem:[%s424_s3] sm:$0xff] }
   0x4   :  { %312 = vmatpush3.msra.mxu0 %v27_v2  ;;  %318 = vmatprep.subr.mxu1 %v340_v0  ;;  %v292_v8 = vld [vmem:[%s425_s2] ss:$0 sm:$0xff] }
   0x5   :  { %314 = vmatmul.mubr.msk.f32.vlgmr.msra.gmra.mxu0 %vm36_vm1, %v26_v3  ;;  %324 = vmatprep.mubr.msk.f32.mxu1 %vm341_vm0, %v340_v0  ;;  %v198_v14 = vld [vmem:[%s426_s6] sm:$0xff] }
   0x6   :  { %327 = vmatprep.subr.mxu0 %v340_v0  ;;  %329 = vmatprep.mubr.msk.f32.mxu0 %vm341_vm0, %v340_v0  ;;  %v294_v15 = vld [vmem:[%s427_s4] ss:$0 sm:$0xff] }
   0x7   :  { %319 = vmatpush3.msra.mxu1 %v113_v5  ;;  %335 = vset.pattern.permute.xlu0 %v342_v13  ;;  %v197_v20 = vld [vmem:[%s428_s5] sm:$0xff] }
   0x8   :  { %320 = vmatprep.subr.mxu1 %v340_v0  ;;  %201 = vperm.xlu0 %335, %v198_v14  }
   0x9   :  { %321 = vmatpush3.msra.mxu1 %v112_v6 }
   0xa   :  { %322 = vmatprep.subr.mxu1 %v340_v0 }
   0xb   :  { %323 = vmatpush3.msra.mxu1 %v111_v7 }
  0x83   :  { %v202_v21 = vpop.permute.xlu0 %201 }
  0xc5   :  { %v106_v9 = vpop.f32.mrf.mxu0 }
  0xc6   :  { %v107_v10 = vadd.f32 %v292_v8, %v106_v9 }
  0xc7   :  { %v315_v11 = vpop.f32.mrf.mxu0 }
  0xc8   :  { %v110_v12 = vmax.f32 %v107_v10, 0.0 }
  0xca   :  { %325 = vmatmul.mubr.msk.f32.vlgmr.msra.gmra.mxu1 %vm122_vm2, %v110_v12 }
 0x18a   :  { %v192_v16 = vpop.f32.mrf.mxu1 }
 0x18b   :  { %v193_v17 = vadd.f32 %v294_v15, %v192_v16 }
 0x18c   :  { %v326_v18 = vpop.f32.mrf.mxu1 }
 0x18d   :  { %v196_v19 = vmax.f32 %v193_v17, 0.0 }
 0x18f   :  { %328 = vmatpush3.xpose.msk.msra.mxu0 %vm36_vm1, %v196_v19 }
 0x192   :  { %330 = vmatmul.mubr.msk.f32.vlgmr.msra.gmra.mxu0 %vm36_vm1, %v197_v20 }
 0x252   :  { %v276_v22 = vpop.f32.mrf.mxu0 }
 0x253   :  { %v277_v23 = vadd.f32 %v276_v22, %v202_v21 }
 0x254   :  { %v331_v24 = vpop.f32.mrf.mxu0 }
 0x255   :  { %v298_v25 = vmul.f32 -1.442695, %v277_v23 }
 0x257   :  { %336 = vpow2.f32 %v298_v25 }
 0x264   :  { %v337_v26 = vpop.eup %336 }
 0x265   :  { %v283_v27 = vadd.f32 1.0, %v337_v26 }
 0x267   :  { %338 = vrcp.f32 %v283_v27 }
 0x274   :  { %v339_v28 = vpop.eup %338 }
 0x275   :  { %287 = vst.msk [vmem:[%s429_s7] sm:$0xff] %vm286_vm3, %v339_v28 }

</bundles_post_ra>
